<compile_context>
chip_gen: v6e
topology: v6e:2x2x1
jax: 0.10.0
libtpu: 0.0.40
codegen_flags: <defaults>
</compile_context>

<pallas_src>
import jax
import jax.numpy as jnp
from jax.experimental import pallas as pl
from jax.experimental.pallas import tpu as pltpu


def mlp_kernel(x_ref, w1_ref, b1_ref, w2_ref, b2_ref,
               w3_ref, b3_ref, w4_ref, b4_ref, o_ref):
    # Cast the x tile to bf16 in-kernel (vcvt hidden under the MXU); weights
    # already bf16; accumulate every matmul in f32 on the MXU.
    x = x_ref[...].astype(jnp.bfloat16)

    # layer1 + ReLU
    h = jnp.dot(x, w1_ref[...], preferred_element_type=jnp.float32) + b1_ref[...]
    h = jnp.maximum(h, 0.0)
    # layer2 + ReLU
    h = jnp.dot(h.astype(jnp.bfloat16), w2_ref[...],
                preferred_element_type=jnp.float32) + b2_ref[...]
    h = jnp.maximum(h, 0.0)
    # layer3 + ReLU
    h = jnp.dot(h.astype(jnp.bfloat16), w3_ref[...],
                preferred_element_type=jnp.float32) + b3_ref[...]
    h = jnp.maximum(h, 0.0)
    # layer4
    logits = jnp.dot(h.astype(jnp.bfloat16), w4_ref[...],
                     preferred_element_type=jnp.float32) + b4_ref[...]

    # Numerically-stable softmax over the last (action) axis.
    # Exact normalization (plain divide) so rows sum to 1 to f32 precision.
    m = jnp.max(logits, axis=-1, keepdims=True)
    e = jnp.exp(logits - m)
    s = jnp.sum(e, axis=-1, keepdims=True)
    o_ref[...] = (e / s).astype(o_ref.dtype)


def _choose_batch_tile(B):
    """Prefer one full-batch step (v5e/v6e single TC: per-step overhead only
    hurts). For big batches, pick the largest 128-aligned tile dividing B,
    preferring an even step count so v7x's two TCs split the 'parallel' axis
    evenly. VMEM is never the binding resource here (weights ~25 KiB)."""
    if B <= 1024:
        return B
    candidates = (4096, 2048, 1024, 512, 256, 128)
    for tb in candidates:                       # even step count first (v7x)
        if B % tb == 0 and (B // tb) % 2 == 0:
            return tb
    for tb in candidates:                       # otherwise fewest steps
        if B % tb == 0:
            return tb
    return B


def mlp_forward(x, params, *, batch_tile=None):
    """x: (B, n_obs) float32. params: dict of bf16 transposed weights
    (in, out) and f32 biases (1, out) — see prepare_params()."""
    B, n_obs = x.shape
    n_actions = params["w4"].shape[1]
    tb = _choose_batch_tile(B) if batch_tile is None else batch_tile
    assert B % tb == 0

    def weight_spec(shape):
        # full weight/bias resident in VMEM for every grid step
        return pl.BlockSpec(shape, lambda i: (0, 0))

    flops = 2 * B * (n_obs * 128 + 128 * 64 + 64 * 32 + 32 * n_actions)
    param_bytes = sum(int(v.size) * v.dtype.itemsize for v in params.values())
    bytes_accessed = 4 * B * n_obs + 4 * B * n_actions + param_bytes
    cost = pl.CostEstimate(flops=flops,
                           transcendentals=B * n_actions,
                           bytes_accessed=bytes_accessed)

    return pl.pallas_call(
        mlp_kernel,
        out_shape=jax.ShapeDtypeStruct((B, n_actions), jnp.float32),
        grid_spec=pltpu.PrefetchScalarGridSpec(
            num_scalar_prefetch=0,
            grid=(B // tb,),
            in_specs=[
                pl.BlockSpec((tb, n_obs), lambda i: (i, 0)),
                weight_spec(params["w1"].shape), weight_spec(params["b1"].shape),
                weight_spec(params["w2"].shape), weight_spec(params["b2"].shape),
                weight_spec(params["w3"].shape), weight_spec(params["b3"].shape),
                weight_spec(params["w4"].shape), weight_spec(params["b4"].shape),
            ],
            out_specs=pl.BlockSpec((tb, n_actions), lambda i: (i, 0)),
        ),
        compiler_params=pltpu.CompilerParams(
            dimension_semantics=("parallel",),
            vmem_limit_bytes=32 * 1024 * 1024),
        cost_estimate=cost,
    )(x, params["w1"], params["b1"], params["w2"], params["b2"],
      params["w3"], params["b3"], params["w4"], params["b4"])


def init_params(key, n_observations, n_actions):
    """Deterministic init mirroring nn.Linear's U(-1/sqrt(fan_in), 1/sqrt(fan_in)).
    Weights stored transposed as (in_features, out_features); biases as (1, out)."""
    sizes = [(n_observations, 128), (128, 64), (64, 32), (32, n_actions)]
    params = {}
    for idx, (fan_in, fan_out) in enumerate(sizes, start=1):
        key, kw, kb = jax.random.split(key, 3)
        bound = 1.0 / jnp.sqrt(jnp.float32(fan_in))
        params[f"w{idx}"] = jax.random.uniform(
            kw, (fan_in, fan_out), jnp.float32, minval=-bound, maxval=bound)
        params[f"b{idx}"] = jax.random.uniform(
            kb, (1, fan_out), jnp.float32, minval=-bound, maxval=bound)
    return params


def prepare_params(params_f32):
    """bf16 weights (MXU operands), f32 biases (elementwise path)."""
    out = {}
    for k, v in params_f32.items():
        out[k] = v.astype(jnp.bfloat16) if k.startswith("w") else v.astype(jnp.float32)
    return out


def mlp_reference(x, params):
    """Pure-JAX reference mirroring the kernel's bf16-operand / f32-accumulate path."""
    h = x.astype(jnp.bfloat16)
    h = jnp.maximum(jnp.dot(h, params["w1"], preferred_element_type=jnp.float32)
                    + params["b1"], 0.0)
    h = jnp.maximum(jnp.dot(h.astype(jnp.bfloat16), params["w2"],
                            preferred_element_type=jnp.float32) + params["b2"], 0.0)
    h = jnp.maximum(jnp.dot(h.astype(jnp.bfloat16), params["w3"],
                            preferred_element_type=jnp.float32) + params["b3"], 0.0)
    logits = jnp.dot(h.astype(jnp.bfloat16), params["w4"],
                     preferred_element_type=jnp.float32) + params["b4"]
    return jax.nn.softmax(logits, axis=-1)


if __name__ == "__main__":
    key = jax.random.PRNGKey(0)
    n_observations, n_actions, batch = 16, 8, 8

    k_params, k_x = jax.random.split(key)
    params = prepare_params(init_params(k_params, n_observations, n_actions))
    x = jax.random.normal(k_x, (batch, n_observations), jnp.float32)

    out = mlp_forward(x, params)
    out = jax.block_until_ready(out)

    ref = mlp_reference(x, params)
    assert out.shape == (batch, n_actions)
    assert jnp.allclose(out, ref, atol=2e-3, rtol=2e-3)
    assert jnp.allclose(jnp.sum(out, axis=-1), 1.0, atol=1e-3)

    print("KERNEL_OK")
</pallas_src>

<mosaic_0001>
module attributes {stable_mosaic.version = 11 : i64} {
  func.func @mlp_kernel(%arg0: i32, %arg1: memref<8x16xf32, #tpu.memory_space<vmem>>, %arg2: memref<16x128xbf16, #tpu.memory_space<vmem>>, %arg3: memref<1x128xf32, #tpu.memory_space<vmem>>, %arg4: memref<128x64xbf16, #tpu.memory_space<vmem>>, %arg5: memref<1x64xf32, #tpu.memory_space<vmem>>, %arg6: memref<64x32xbf16, #tpu.memory_space<vmem>>, %arg7: memref<1x32xf32, #tpu.memory_space<vmem>>, %arg8: memref<32x8xbf16, #tpu.memory_space<vmem>>, %arg9: memref<1x8xf32, #tpu.memory_space<vmem>>, %arg10: memref<8x8xf32, #tpu.memory_space<vmem>>) attributes {dimension_semantics = [#tpu.dimension_semantics<parallel>], iteration_bounds = array<i64: 1>, scalar_prefetch = 0 : i64, scratch_operands = 0 : i64, tpu.core_type = #tpu.core_type<tc>, window_params = [{transform_indices = @transform_0, window_bounds = array<i64: 8, 16>}, {pipeline_mode = #tpu.pipeline_mode<synchronous>, transform_indices = @transform_1, window_bounds = array<i64: 16, 128>}, {pipeline_mode = #tpu.pipeline_mode<synchronous>, transform_indices = @transform_2, window_bounds = array<i64: 1, 128>}, {pipeline_mode = #tpu.pipeline_mode<synchronous>, transform_indices = @transform_3, window_bounds = array<i64: 128, 64>}, {pipeline_mode = #tpu.pipeline_mode<synchronous>, transform_indices = @transform_4, window_bounds = array<i64: 1, 64>}, {pipeline_mode = #tpu.pipeline_mode<synchronous>, transform_indices = @transform_5, window_bounds = array<i64: 64, 32>}, {pipeline_mode = #tpu.pipeline_mode<synchronous>, transform_indices = @transform_6, window_bounds = array<i64: 1, 32>}, {pipeline_mode = #tpu.pipeline_mode<synchronous>, transform_indices = @transform_7, window_bounds = array<i64: 32, 8>}, {pipeline_mode = #tpu.pipeline_mode<synchronous>, transform_indices = @transform_8, window_bounds = array<i64: 1, 8>}, {transform_indices = @transform_9, window_bounds = array<i64: 8, 8>}]} {
    %c0 = arith.constant 0 : index
    %c0_0 = arith.constant 0 : index
    %0 = vector.load %arg1[%c0, %c0_0] : memref<8x16xf32, #tpu.memory_space<vmem>>, vector<8x16xf32>
    %1 = arith.truncf %0 : vector<8x16xf32> to vector<8x16xbf16>
    %c0_1 = arith.constant 0 : index
    %c0_2 = arith.constant 0 : index
    %2 = vector.load %arg2[%c0_1, %c0_2] : memref<16x128xbf16, #tpu.memory_space<vmem>>, vector<16x128xbf16>
    %cst = arith.constant dense<0.000000e+00> : vector<8x128xf32>
    %3 = tpu.matmul %1, %2, %cst {dimension_numbers = #tpu.dot_dimension_numbers<[1], [0], [0], [1], [0, 0, 1, 1], [], []>} : vector<8x16xbf16>, vector<16x128xbf16>, vector<8x128xf32> -> vector<8x128xf32>
    %c0_3 = arith.constant 0 : index
    %c0_4 = arith.constant 0 : index
    %4 = vector.load %arg3[%c0_3, %c0_4] : memref<1x128xf32, #tpu.memory_space<vmem>>, vector<1x128xf32>
    %5 = vector.broadcast %4 : vector<1x128xf32> to vector<8x128xf32>
    %6 = arith.addf %3, %5 : vector<8x128xf32>
    %cst_5 = arith.constant 0.000000e+00 : f32
    %7 = vector.broadcast %cst_5 : f32 to vector<8x128xf32>
    %8 = arith.maximumf %6, %7 : vector<8x128xf32>
    %9 = arith.truncf %8 : vector<8x128xf32> to vector<8x128xbf16>
    %c0_6 = arith.constant 0 : index
    %c0_7 = arith.constant 0 : index
    %10 = vector.load %arg4[%c0_6, %c0_7] : memref<128x64xbf16, #tpu.memory_space<vmem>>, vector<128x64xbf16>
    %cst_8 = arith.constant dense<0.000000e+00> : vector<8x64xf32>
    %11 = tpu.matmul %9, %10, %cst_8 {dimension_numbers = #tpu.dot_dimension_numbers<[1], [0], [0], [1], [0, 0, 1, 1], [], []>} : vector<8x128xbf16>, vector<128x64xbf16>, vector<8x64xf32> -> vector<8x64xf32>
    %c0_9 = arith.constant 0 : index
    %c0_10 = arith.constant 0 : index
    %12 = vector.load %arg5[%c0_9, %c0_10] : memref<1x64xf32, #tpu.memory_space<vmem>>, vector<1x64xf32>
    %13 = vector.broadcast %12 : vector<1x64xf32> to vector<8x64xf32>
    %14 = arith.addf %11, %13 : vector<8x64xf32>
    %cst_11 = arith.constant 0.000000e+00 : f32
    %15 = vector.broadcast %cst_11 : f32 to vector<8x64xf32>
    %16 = arith.maximumf %14, %15 : vector<8x64xf32>
    %17 = arith.truncf %16 : vector<8x64xf32> to vector<8x64xbf16>
    %c0_12 = arith.constant 0 : index
    %c0_13 = arith.constant 0 : index
    %18 = vector.load %arg6[%c0_12, %c0_13] : memref<64x32xbf16, #tpu.memory_space<vmem>>, vector<64x32xbf16>
    %cst_14 = arith.constant dense<0.000000e+00> : vector<8x32xf32>
    %19 = tpu.matmul %17, %18, %cst_14 {dimension_numbers = #tpu.dot_dimension_numbers<[1], [0], [0], [1], [0, 0, 1, 1], [], []>} : vector<8x64xbf16>, vector<64x32xbf16>, vector<8x32xf32> -> vector<8x32xf32>
    %c0_15 = arith.constant 0 : index
    %c0_16 = arith.constant 0 : index
    %20 = vector.load %arg7[%c0_15, %c0_16] : memref<1x32xf32, #tpu.memory_space<vmem>>, vector<1x32xf32>
    %21 = vector.broadcast %20 : vector<1x32xf32> to vector<8x32xf32>
    %22 = arith.addf %19, %21 : vector<8x32xf32>
    %cst_17 = arith.constant 0.000000e+00 : f32
    %23 = vector.broadcast %cst_17 : f32 to vector<8x32xf32>
    %24 = arith.maximumf %22, %23 : vector<8x32xf32>
    %25 = arith.truncf %24 : vector<8x32xf32> to vector<8x32xbf16>
    %c0_18 = arith.constant 0 : index
    %c0_19 = arith.constant 0 : index
    %26 = vector.load %arg8[%c0_18, %c0_19] : memref<32x8xbf16, #tpu.memory_space<vmem>>, vector<32x8xbf16>
    %cst_20 = arith.constant dense<0.000000e+00> : vector<8x8xf32>
    %27 = tpu.matmul %25, %26, %cst_20 {dimension_numbers = #tpu.dot_dimension_numbers<[1], [0], [0], [1], [0, 0, 1, 1], [], []>} : vector<8x32xbf16>, vector<32x8xbf16>, vector<8x8xf32> -> vector<8x8xf32>
    %c0_21 = arith.constant 0 : index
    %c0_22 = arith.constant 0 : index
    %28 = vector.load %arg9[%c0_21, %c0_22] : memref<1x8xf32, #tpu.memory_space<vmem>>, vector<1x8xf32>
    %29 = vector.broadcast %28 : vector<1x8xf32> to vector<8x8xf32>
    %30 = arith.addf %27, %29 : vector<8x8xf32>
    %cst_23 = arith.constant dense<0xFF800000> : vector<8xf32>
    %31 = vector.multi_reduction <maximumf>, %30, %cst_23 [1] : vector<8x8xf32> to vector<8xf32>
    %32 = vector.shape_cast %31 : vector<8xf32> to vector<8x1xf32>
    %33 = vector.broadcast %32 : vector<8x1xf32> to vector<8x8xf32>
    %34 = arith.subf %30, %33 : vector<8x8xf32>
    %35 = math.exp %34 : vector<8x8xf32>
    %cst_24 = arith.constant dense<0.000000e+00> : vector<8xf32>
    %36 = vector.multi_reduction <add>, %35, %cst_24 [1] : vector<8x8xf32> to vector<8xf32>
    %37 = vector.shape_cast %36 : vector<8xf32> to vector<8x1xf32>
    %38 = vector.broadcast %37 : vector<8x1xf32> to vector<8x8xf32>
    %39 = arith.divf %35, %38 : vector<8x8xf32>
    %c0_25 = arith.constant 0 : index
    %c0_26 = arith.constant 0 : index
    %40 = vector.load %arg10[%c0_25, %c0_26] : memref<8x8xf32, #tpu.memory_space<vmem>>, vector<8x8xf32>
    tpu.vector_store %arg10[%c0_25, %c0_26], %39 {strides = array<i32>} : memref<8x8xf32, #tpu.memory_space<vmem>>, vector<8x8xf32>,
    return
  }
  func.func @transform_0(%arg0: i32) -> (i32, i32) {
    %c0_i32 = arith.constant 0 : i32
    %c0_i32_0 = arith.constant 0 : i32
    return %arg0, %c0_i32 : i32, i32
  }
  func.func @transform_1(%arg0: i32) -> (i32, i32) {
    %c0_i32 = arith.constant 0 : i32
    %c0_i32_0 = arith.constant 0 : i32
    %c0_i32_1 = arith.constant 0 : i32
    return %c0_i32, %c0_i32_0 : i32, i32
  }
  func.func @transform_2(%arg0: i32) -> (i32, i32) {
    %c0_i32 = arith.constant 0 : i32
    %c0_i32_0 = arith.constant 0 : i32
    %c0_i32_1 = arith.constant 0 : i32
    return %c0_i32, %c0_i32_0 : i32, i32
  }
  func.func @transform_3(%arg0: i32) -> (i32, i32) {
    %c0_i32 = arith.constant 0 : i32
    %c0_i32_0 = arith.constant 0 : i32
    %c0_i32_1 = arith.constant 0 : i32
    return %c0_i32, %c0_i32_0 : i32, i32
  }
  func.func @transform_4(%arg0: i32) -> (i32, i32) {
    %c0_i32 = arith.constant 0 : i32
    %c0_i32_0 = arith.constant 0 : i32
    %c0_i32_1 = arith.constant 0 : i32
    return %c0_i32, %c0_i32_0 : i32, i32
  }
  func.func @transform_5(%arg0: i32) -> (i32, i32) {
    %c0_i32 = arith.constant 0 : i32
    %c0_i32_0 = arith.constant 0 : i32
    %c0_i32_1 = arith.constant 0 : i32
    return %c0_i32, %c0_i32_0 : i32, i32
  }
  func.func @transform_6(%arg0: i32) -> (i32, i32) {
    %c0_i32 = arith.constant 0 : i32
    %c0_i32_0 = arith.constant 0 : i32
    %c0_i32_1 = arith.constant 0 : i32
    return %c0_i32, %c0_i32_0 : i32, i32
  }
  func.func @transform_7(%arg0: i32) -> (i32, i32) {
    %c0_i32 = arith.constant 0 : i32
    %c0_i32_0 = arith.constant 0 : i32
    %c0_i32_1 = arith.constant 0 : i32
    return %c0_i32, %c0_i32_0 : i32, i32
  }
  func.func @transform_8(%arg0: i32) -> (i32, i32) {
    %c0_i32 = arith.constant 0 : i32
    %c0_i32_0 = arith.constant 0 : i32
    %c0_i32_1 = arith.constant 0 : i32
    return %c0_i32, %c0_i32_0 : i32, i32
  }
  func.func @transform_9(%arg0: i32) -> (i32, i32) {
    %c0_i32 = arith.constant 0 : i32
    %c0_i32_0 = arith.constant 0 : i32
    return %arg0, %c0_i32 : i32, i32
  }
}

</mosaic_0001>

<bundles_post_ra>
// kernel: tpu_custom_call.1
= control target key start
LH: loop header
LB: loop body
LE: loop exit
PB: predicated region body
PF: predicated region fallthrough
CT: control target
= control target key end

     0   :  { %v520_v1 = vmov 0.0   ;;  %vm51_vm0 = vcmask 130048   ;;  %vm521_vm1 = vmmov 0   ;;  %s662_s0 = inlined_call_operand.vmem [shape: f32[8,16], index: 0, kind: input, shape index: {}]   ;;  %s663_s1 = inlined_call_operand.vmem [shape: bf16[16,128], index: 1, kind: input, shape index: {}]   ;;  %s664_s2 = inlined_call_operand.vmem [shape: f32[1,128], index: 2, kind: input, shape index: {}]   ;;  %s665_s3 = inlined_call_operand.vmem [shape: bf16[128,64], index: 3, kind: input, shape index: {}]   ;;  %s666_s4 = inlined_call_operand.vmem [shape: f32[1,64], index: 4, kind: input, shape index: {}]   ;;  %s667_s5 = inlined_call_operand.vmem [shape: bf16[64,32], index: 5, kind: input, shape index: {}]   ;;  %s668_s6 = inlined_call_operand.vmem [shape: f32[1,32], index: 6, kind: input, shape index: {}]   ;;  %s669_s7 = inlined_call_operand.vmem [shape: bf16[32,8], index: 7, kind: input, shape index: {}]   ;;  %s670_s8 = inlined_call_operand.vmem [shape: f32[1,8], index: 8, kind: input, shape index: {}]   ;;  %s671_s9 = inlined_call_operand.hbm [shape: f32[8,8], index: 9, kind: output, shape index: {}]  }
   0x1   :  { %v479_v0 = vld [vmem:[%s663_s1] sm:$0xff]   ;;  %430 = vmatprep.subr.bf16.mxu0 %v520_v1  ;;  %436 = vmatprep.subr.bf16.mxu1 %v520_v1  ;;  %v480_v3 = vld [vmem:[%s665_s3 + $0x38] sm:$0xff]   ;;  %v481_v5 = vld [vmem:[%s665_s3 + $0x30] sm:$0xff]  }
   0x2   :  { %v34_v2 = vld [vmem:[%s662_s0] sm:$0xff]  ;;  %431 = vmatpush3.bf16.msra.mxu0 %v479_v0  ;;  %432 = vmatprep.mubr.msk.bf16.mxu0 %vm521_vm1, %v520_v1  ;;  %v482_v6 = vld [vmem:[%s665_s3 + $0x28] sm:$0xff]  }
   0x3   :  { %v35_v4 = vpack.c.bf16 %v34_v2, %v34_v2  ;;  %437 = vmatpush3.bf16.msra.mxu1 %v480_v3  ;;  %452 = vmatprep.mubr.msk.bf16.mxu1 %vm521_vm1, %v520_v1  ;;  %v483_v7 = vld [vmem:[%s665_s3 + $0x20] sm:$0xff]  }
   0x4   :  { %438 = vmatprep.subr.bf16.mxu1 %v520_v1  ;;  %456 = vmatprep.subr.bf16.mxu0 %v520_v1 }
   0x5   :  { %433 = vmatmul.mubr.msk.bf16.vlgmr.msra.gmra.mxu0 %vm51_vm0, %v35_v4 }
   0x6   :  { %464 = vmatprep.mubr.msk.bf16.mxu0 %vm521_vm1, %v520_v1 }
   0x7   :  { %439 = vmatpush3.bf16.msra.mxu1 %v481_v5 }
   0x8   :  { %440 = vmatprep.subr.bf16.mxu1 %v520_v1 }
   0xb   :  { %441 = vmatpush3.bf16.msra.mxu1 %v482_v6 }
   0xc   :  { %442 = vmatprep.subr.bf16.mxu1 %v520_v1 }
   0xd   :  { %14 = vsyncpa [#allocation3], 0  ;;  %v484_v8 = vld [vmem:[%s665_s3 + $0x18] sm:$0xff]   ;;  %v485_v9 = vld [vmem:[%s665_s3 + $0x10] sm:$0xff]   ;;  %vm249_vm2 = vcmask 523264   ;;  %vm318_vm3 = vcmask 261120  }
   0xe   :  { %v486_v10 = vld [vmem:[%s665_s3 + $0x8] sm:$0xff]   ;;  %v487_v11 = vld [vmem:[%s665_s3] sm:$0xff]   ;;  %v488_v12 = vld [vmem:[%s667_s5 + $0x18] sm:$0xff]   ;;  %vm362_vm4 = vcmask 64512  }
   0xf   :  { %443 = vmatpush3.bf16.msra.mxu1 %v483_v7  ;;  %457 = vmatpush3.bf16.msra.mxu0 %v488_v12  ;;  %v489_v13 = vld [vmem:[%s667_s5 + $0x10] sm:$0xff]   ;;  %v389_v14 = vld [vmem:[%s664_s2] ss:$0 sm:$0xff]  ;;  %v490_v22 = vld [vmem:[%s667_s5 + $0x8] sm:$0xff]  }
  0x10   :  { %444 = vmatprep.subr.bf16.mxu1 %v520_v1  ;;  %458 = vmatprep.subr.bf16.mxu0 %v520_v1  ;;  %v491_v23 = vld [vmem:[%s667_s5] sm:$0xff]   ;;  %v492_v30 = vld [vmem:[%s669_s7 + $0x8] sm:$0xff]  }
  0x11   :  { %v392_v24 = vld [vmem:[%s666_s4] ss:$0 sm:$0xff] }
  0x12   :  { %v493_v33 = vld [vmem:[%s669_s7] sm:$0xff]  }
  0x13   :  { %445 = vmatpush3.bf16.msra.mxu1 %v484_v8  ;;  %459 = vmatpush3.bf16.msra.mxu0 %v489_v13  ;;  %v401_v34 = vld [vmem:[%s668_s6] ss:$0 sm:$0xff]  ;;  %s522_s6 = smov [#allocation2]  }
  0x14   :  { %446 = vmatprep.subr.bf16.mxu1 %v520_v1  ;;  %460 = vmatprep.subr.bf16.mxu0 %v520_v1  ;;  %v407_v42 = vld [vmem:[%s670_s8] ss:$0 sm:$0xff]  ;;  %s381_s7 = sshll.u32 %s522_s6, 4  ;;  %s382_s7 = int_to_ptr.vmem [resolvable:$true] %s381_s7 }
  0x15   :  { %s498_s8 = scalar_lea.vmem %s382_s7, 128  ;;  %p503_p1 = scmp.lt.s32.totalorder %s382_s7, %s382_s7 }
  0x16   :  { %p499_p0 = scmp.ne.s32.totalorder %s382_s7, %s498_s8  ;;  %p504_p2 = scmp.lt.s32.totalorder %s498_s8, %s498_s8 }
  0x17   :  { %447 = vmatpush3.bf16.msra.mxu1 %v485_v9  ;;  %461 = vmatpush3.bf16.msra.mxu0 %v490_v22 }
  0x18   :  { %448 = vmatprep.subr.bf16.mxu1 %v520_v1  ;;  %462 = vmatprep.subr.bf16.mxu0 %v520_v1  ;;  %p505_p3 = por %p504_p2, %p503_p1 }
  0x1a   :  { %p506_p4 = pnand %p505_p3, %p499_p0 }
  0x1b   :  { %449 = vmatpush3.bf16.msra.mxu1 %v486_v10  ;;  %463 = vmatpush3.bf16.msra.mxu0 %v491_v23 }
  0x1c   :  { %450 = vmatprep.subr.bf16.mxu1 %v520_v1  ;;  %468 = vmatprep.subr.bf16.mxu0 %v520_v1 }
  0x1f   :  { %451 = vmatpush3.bf16.msra.mxu1 %v487_v11 }
  0xc5   :  { %v89_v15 = vpop.f32.mrf.mxu0 }
  0xc6   :  { %v90_v16 = vadd.f32 %v389_v14, %v89_v15 }
  0xc7   :  { %v434_v17 = vpop.f32.mrf.mxu0 }
  0xc8   :  { %v95_v18 = vmax.f32 %v90_v16, 0.0 }
  0xc9   :  { %v92_v19 = vpop.f32.mrf.mxu0 }
  0xca   :  { %v96_v20 = vpack.c.bf16 %v95_v18, %v95_v18 }
  0xcb   :  { %v435_v21 = vpop.f32.mrf.mxu0 }
  0xcc   :  { %453 = vmatmul.mubr.bf16.vlgmr.msra.gmra.mxu1 %v96_v20 }
 0x18c   :  { %v202_v25 = vpop.f32.mrf.mxu1 }
 0x18d   :  { %v203_v26 = vadd.f32 %v392_v24, %v202_v25 }
 0x18e   :  { %v454_v27 = vpop.f32.mrf.mxu1 }
 0x18f   :  { %v208_v28 = vmax.f32 %v203_v26, 0.0 }
 0x190   :  { %v205_v29 = vpop.f32.mrf.mxu1 }
 0x191   :  { %v209_v31 = vpack.c.bf16 %v208_v28, %v208_v28 }
 0x192   :  { %v455_v32 = vpop.f32.mrf.mxu1 }
 0x193   :  { %465 = vmatmul.mubr.msk.bf16.vlgmr.msra.gmra.mxu0 %vm249_vm2, %v209_v31 }
 0x194   :  { %469 = vmatpush3.bf16.msra.mxu0 %v492_v30  ;;  %472 = vmatprep.mubr.msk.bf16.mxu0 %vm521_vm1, %v520_v1 }
 0x195   :  { %470 = vmatprep.subr.bf16.mxu0 %v520_v1 }
 0x198   :  { %471 = vmatpush3.bf16.msra.mxu0 %v493_v33 }
 0x253   :  { %v287_v35 = vpop.f32.mrf.mxu0 }
 0x254   :  { %v288_v36 = vadd.f32 %v401_v34, %v287_v35 }
 0x255   :  { %v466_v37 = vpop.f32.mrf.mxu0 }
 0x256   :  { %v293_v38 = vmax.f32 %v288_v36, 0.0 }
 0x257   :  { %v290_v39 = vpop.f32.mrf.mxu0 }
 0x258   :  { %v294_v40 = vpack.c.bf16 %v293_v38, %v293_v38 }
 0x259   :  { %v467_v41 = vpop.f32.mrf.mxu0 }
 0x25a   :  { %473 = vmatmul.mubr.msk.bf16.vlgmr.msra.gmra.mxu0 %vm318_vm3, %v294_v40 }
 0x31a   :  { %v356_v43 = vpop.f32.mrf.mxu0 }
 0x31b   :  { %v357_v44 = vadd.f32 %v407_v42, %v356_v43 }
 0x31c   :  { %v474_v45 = vpop.f32.mrf.mxu0 }
 0x31d   :  { %v363_v46 = vsel %vm362_vm4, %v357_v44, -inf }
 0x31e   :  { %364 = vmax.xlane.f32.xlu0 %v363_v46  ;;  %v359_v47 = vpop.f32.mrf.mxu0 }
 0x320   :  { %v475_v48 = vpop.f32.mrf.mxu0 }
 0x3a7   :  { %v365_v49 = vpop.xlane.xlu0 %364 }
 0x3a8   :  { %v366_v50 = vsub.f32 %v357_v44, %v365_v49 }
 0x3aa   :  { %v367_v51 = vmul.f32 1.442695, %v366_v50 }
 0x3ac   :  { %494 = vpow2.f32 %v367_v51 }
 0x3b9   :  { %v495_v52 = vpop.eup %494 }
 0x3ba   :  { %v369_v53 = vsel %vm362_vm4, %v495_v52, 0.0 }
 0x3bb   :  { %370 = vadd.xlane.f32.xlu0 %v369_v53 }
 0x444   :  { %v371_v54 = vpop.xlane.xlu0 %370 }
 0x445   :  { %496 = vrcp.f32 %v371_v54 }
 0x452   :  { %v497_v55 = vpop.eup %496 }
 0x453   :  { %v373_v56 = vmul.f32 %v497_v55, %v495_v52 }
 0x455   :  { %374 = vst.msk [vmem:[#allocation2] sm:$0xff] %vm362_vm4, %v373_v56 }
 0x456   :  { %509 = shalt.err (!%p506_p4)
}
 0x457   :  { %384 = dma.vmem_to_hbm [thread:$0]  %s382_s7, 128, %s671_s9, [#allocation3]  }
 0x458   :  { %518 = dma.done.wait [#allocation3], 128  }
 0x459   :  { %519 = vsyncadd [#allocation3], 4294967168 }
 0x45a   :  { %388 = vsyncpa [#allocation3], 1 }

</bundles_post_ra>
